<compile_context>
chip_gen: v7x
topology: tpu7x:2x2x1
jax: 0.10.0
libtpu: 0.0.40
codegen_flags: <defaults>
</compile_context>

<pallas_src>
import functools

import jax
import jax.numpy as jnp
from jax.experimental import pallas as pl
from jax.experimental.pallas import tpu as pltpu

LANE = 128      # TPU lane width (fast axis)
SUBLANE = 8     # TPU sublane count (slow axis)
MAX_TILE_B = 1024   # big tiles amortize per-grid-step overhead; VMEM stays tiny


def _round_up(n, m):
    return ((n + m - 1) // m) * m


def _choose_tile_b(batch):
    """Pick a batch tile: big enough to amortize per-step overhead, but keep
    the grid length >= 2 at mid/large batch so v7x's two TensorCores both work.
    """
    if batch <= 2 * SUBLANE:
        # Tiny batch: a single full-extent block (block dim == array dim is legal).
        return batch
    if batch <= 2 * MAX_TILE_B:
        # Split into ~2 sublane-aligned tiles (ragged last block is masked by Pallas).
        return min(MAX_TILE_B, _round_up(pl.cdiv(batch, 2), SUBLANE))
    return MAX_TILE_B


def fused_linear_kernel(x_ref, w_ref, b_ref, out_ref):
    # Single MXU matmul with f32 accumulation + one VPU bias add.
    out_ref[...] = (
        jnp.dot(x_ref[...], w_ref[...], preferred_element_type=jnp.float32)
        + b_ref[...]
    ).astype(out_ref.dtype)


def fold_params(params):
    """Collapse the affine chain into one (W_eff, b_eff).

    Runs ONCE at model-preparation time (not per forward call).
    """
    w1, w2, w3, w4 = params["w1"], params["w2"], params["w3"], params["w4"]
    b1, b2, b3, b4 = params["b1"], params["b2"], params["b3"], params["b4"]
    w_eff = w1 @ w2 @ w3 @ w4                               # [in_dim, out_dim]
    b_eff = ((b1 @ w2 + b2) @ w3 + b3) @ w4 + b4            # [1, out_dim]
    return w_eff, b_eff


@functools.partial(jax.jit)
def neural_network_forward(x, w_eff, b_eff):
    """Forward pass: out = x @ W_eff + b_eff, tiled over the batch axis.

    x:      [batch, in_dim]  float32
    w_eff:  [in_dim, out_dim] float32 (pre-folded, cached)
    b_eff:  [1, out_dim]      float32 (pre-folded, cached)
    """
    batch, in_dim = x.shape
    out_dim = w_eff.shape[1]

    tile_b = _choose_tile_b(batch)
    grid = (pl.cdiv(batch, tile_b),)   # no batch padding; ragged last block is masked

    itemsize = 4
    cost = pl.CostEstimate(
        flops=2 * batch * in_dim * out_dim,
        transcendentals=0,
        bytes_accessed=(batch * in_dim + in_dim * out_dim + out_dim
                        + batch * out_dim) * itemsize,
    )

    return pl.pallas_call(
        fused_linear_kernel,
        out_shape=jax.ShapeDtypeStruct((batch, out_dim), jnp.float32),
        grid_spec=pltpu.PrefetchScalarGridSpec(
            num_scalar_prefetch=0,
            grid=grid,
            in_specs=[
                # x: tiled over batch; last dim equals full K (in_dim) -> legal block,
                # K is deliberately NOT padded to 128.
                pl.BlockSpec((tile_b, in_dim), lambda i: (i, 0)),
                # W_eff / b_eff: full arrays, resident across all grid steps.
                pl.BlockSpec((in_dim, out_dim), lambda i: (0, 0)),
                pl.BlockSpec((1, out_dim), lambda i: (0, 0)),
            ],
            # Direct (batch, out_dim) output: no 128-lane padding, no post-slice.
            out_specs=pl.BlockSpec((tile_b, out_dim), lambda i: (i, 0)),
        ),
        compiler_params=pltpu.CompilerParams(
            # Batch tiles are independent -> shard across TensorCores (v7x).
            dimension_semantics=("parallel",),
            vmem_limit_bytes=32 * 1024 * 1024,
        ),
        cost_estimate=cost,
    )(x, w_eff, b_eff)


def init_linear_params(key, in_dim, out_dim):
    """nn.Linear default init: U(-1/sqrt(in), 1/sqrt(in)).

    Weight returned already transposed to [in_dim, out_dim] (PyTorch stores
    [out_dim, in_dim] and computes x @ W.T; we fold the transpose here).
    """
    kw, kb = jax.random.split(key)
    bound = 1.0 / jnp.sqrt(jnp.float32(in_dim))
    w = jax.random.uniform(kw, (in_dim, out_dim), jnp.float32, -bound, bound)
    b = jax.random.uniform(kb, (1, out_dim), jnp.float32, -bound, bound)
    return w, b


def reference_forward(x, params):
    """Pure-JAX layer-by-layer chain, mirroring the PyTorch forward exactly."""
    h = x @ params["w1"] + params["b1"]
    h = h @ params["w2"] + params["b2"]
    h = h @ params["w3"] + params["b3"]
    h = h @ params["w4"] + params["b4"]
    return h


if __name__ == "__main__":
    # Shapes consistent with the module's constructor:
    # NeuralNetwork(in_dim=32, n_hidden_1=64, n_hidden_2=64, n_hidden_3=32, out_dim=16)
    batch, in_dim = 8, 32
    n_hidden_1, n_hidden_2, n_hidden_3, out_dim = 64, 64, 32, 16

    key = jax.random.PRNGKey(0)
    kx, k1, k2, k3, k4 = jax.random.split(key, 5)

    x = jax.random.normal(kx, (batch, in_dim), jnp.float32)

    w1, b1 = init_linear_params(k1, in_dim, n_hidden_1)
    w2, b2 = init_linear_params(k2, n_hidden_1, n_hidden_2)
    w3, b3 = init_linear_params(k3, n_hidden_2, n_hidden_3)
    w4, b4 = init_linear_params(k4, n_hidden_3, out_dim)

    params = dict(w1=w1, b1=b1, w2=w2, b2=b2, w3=w3, b3=b3, w4=w4, b4=b4)

    # One-time parameter preparation (hoisted out of the per-call path).
    w_eff, b_eff = fold_params(params)
    w_eff = jax.block_until_ready(w_eff)
    b_eff = jax.block_until_ready(b_eff)

    out = neural_network_forward(x, w_eff, b_eff)
    out = jax.block_until_ready(out)

    ref = reference_forward(x, params)
    assert out.shape == (batch, out_dim), out.shape
    # Folding only reassociates float ops; tolerance covers the tiny reordering error.
    assert jnp.allclose(out, ref, atol=1e-4, rtol=1e-4), "mismatch vs pure-JAX reference"

    print("KERNEL_OK")
</pallas_src>

<mosaic_0001>
module attributes {stable_mosaic.version = 11 : i64} {
  func.func @fused_linear_kernel(%arg0: i32, %arg1: memref<8x32xf32, #tpu.memory_space<vmem>>, %arg2: memref<32x16xf32, #tpu.memory_space<vmem>>, %arg3: memref<1x16xf32, #tpu.memory_space<vmem>>, %arg4: memref<8x16xf32, #tpu.memory_space<vmem>>) attributes {dimension_semantics = [#tpu.dimension_semantics<parallel>], iteration_bounds = array<i64: 1>, scalar_prefetch = 0 : i64, scratch_operands = 0 : i64, tpu.core_type = #tpu.core_type<tc>, window_params = [{transform_indices = @transform_0, window_bounds = array<i64: 8, 32>}, {pipeline_mode = #tpu.pipeline_mode<synchronous>, transform_indices = @transform_1, window_bounds = array<i64: 32, 16>}, {pipeline_mode = #tpu.pipeline_mode<synchronous>, transform_indices = @transform_2, window_bounds = array<i64: 1, 16>}, {transform_indices = @transform_3, window_bounds = array<i64: 8, 16>}]} {
    %c0 = arith.constant 0 : index
    %c0_0 = arith.constant 0 : index
    %0 = vector.load %arg1[%c0, %c0_0] : memref<8x32xf32, #tpu.memory_space<vmem>>, vector<8x32xf32>
    %c0_1 = arith.constant 0 : index
    %c0_2 = arith.constant 0 : index
    %1 = vector.load %arg2[%c0_1, %c0_2] : memref<32x16xf32, #tpu.memory_space<vmem>>, vector<32x16xf32>
    %cst = arith.constant dense<0.000000e+00> : vector<8x16xf32>
    %2 = tpu.matmul %0, %1, %cst {dimension_numbers = #tpu.dot_dimension_numbers<[1], [0], [0], [1], [0, 0, 1, 1], [], []>} : vector<8x32xf32>, vector<32x16xf32>, vector<8x16xf32> -> vector<8x16xf32>
    %c0_3 = arith.constant 0 : index
    %c0_4 = arith.constant 0 : index
    %3 = vector.load %arg3[%c0_3, %c0_4] : memref<1x16xf32, #tpu.memory_space<vmem>>, vector<1x16xf32>
    %4 = vector.broadcast %3 : vector<1x16xf32> to vector<8x16xf32>
    %5 = arith.addf %2, %4 : vector<8x16xf32>
    %c0_5 = arith.constant 0 : index
    %c0_6 = arith.constant 0 : index
    %6 = vector.load %arg4[%c0_5, %c0_6] : memref<8x16xf32, #tpu.memory_space<vmem>>, vector<8x16xf32>
    tpu.vector_store %arg4[%c0_5, %c0_6], %5 {strides = array<i32>} : memref<8x16xf32, #tpu.memory_space<vmem>>, vector<8x16xf32>,
    return
  }
  func.func @transform_0(%arg0: i32) -> (i32, i32) {
    %c0_i32 = arith.constant 0 : i32
    %c0_i32_0 = arith.constant 0 : i32
    return %arg0, %c0_i32 : i32, i32
  }
  func.func @transform_1(%arg0: i32) -> (i32, i32) {
    %c0_i32 = arith.constant 0 : i32
    %c0_i32_0 = arith.constant 0 : i32
    %c0_i32_1 = arith.constant 0 : i32
    return %c0_i32, %c0_i32_0 : i32, i32
  }
  func.func @transform_2(%arg0: i32) -> (i32, i32) {
    %c0_i32 = arith.constant 0 : i32
    %c0_i32_0 = arith.constant 0 : i32
    %c0_i32_1 = arith.constant 0 : i32
    return %c0_i32, %c0_i32_0 : i32, i32
  }
  func.func @transform_3(%arg0: i32) -> (i32, i32) {
    %c0_i32 = arith.constant 0 : i32
    %c0_i32_0 = arith.constant 0 : i32
    return %arg0, %c0_i32 : i32, i32
  }
}

</mosaic_0001>

<bundles_post_ra>
// kernel: neural_network_forward.1
= control target key start
LH: loop header
LB: loop body
LE: loop exit
PB: predicated region body
PF: predicated region fallthrough
CT: control target
= control target key end

     0   :  { %v169_v3 = vmov 0.0|0.0   ;;  %vm170_vm0 = vmmov 0   ;;  %v171_v6 = vmov 0.0   ;;  %s223_s0 = inlined_call_operand.vmem [shape: f32[8,32], index: 0, kind: input, shape index: {}]   ;;  %s224_s1 = inlined_call_operand.vmem [shape: f32[32,16], index: 1, kind: input, shape index: {}]   ;;  %s225_s2 = inlined_call_operand.vmem [shape: f32[1,16], index: 2, kind: input, shape index: {}]   ;;  %s226_s3 = inlined_call_operand.hbm [shape: f32[8,16], index: 3, kind: output, shape index: {}]  }
   0x1   :  { %v16_v0 = vld [vmem:[%s224_s1] sm:$0xff]  ;;  %v17_v1 = vld [vmem:[%s224_s1 + $0x8] sm:$0xff]  ;;  %v18_v2 = vld [vmem:[%s224_s1 + $0x10] sm:$0xff]  ;;  %135 = vmatprep.subr.bf16.mxu0 %v169_v3  ;;  %132 = vmatprep.mubr.msk.f32.mxu0 %vm170_vm0, %v171_v6 }
   0x2   :  { %v136_v4 = vpack.c.bf16 %v17_v1, %v16_v0  ;;  %v19_v5 = vld [vmem:[%s224_s1 + $0x18] sm:$0xff] }
   0x3   :  { %8 = vsyncpa [#allocation3], 0  ;;  %v139_v7 = vpack.c.bf16 %v19_v5, %v18_v2  ;;  %v15_v8 = vld [vmem:[%s223_s0] sm:$0xff]  ;;  %vm27_vm1 = vcmask 261120   ;;  %s172_s24 = smov [#allocation2]   ;;  %vm101_vm2 = vcmask 130048  }
   0x4   :  { %137 = vmatpush3.bf16.msra.mxu0 %v136_v4  ;;  %v117_v9 = vld [vmem:[%s225_s2] ss:$0 sm:$0xff]  ;;  %s109_s1 = sshll.u32 %s172_s24, 4  ;;  %s110_s1 = int_to_ptr.vmem [resolvable:$true] %s109_s1 }
   0x5   :  { %138 = vmatprep.subr.bf16.mxu0 %v169_v3  ;;  %s145_s25 = scalar_lea.vmem %s110_s1, 128  ;;  %p150_p1 = scmp.lt.s32.totalorder %s110_s1, %s110_s1 }
   0x6   :  { %p146_p0 = scmp.ne.s32.totalorder %s110_s1, %s145_s25  ;;  %p151_p2 = scmp.lt.s32.totalorder %s145_s25, %s145_s25 }
   0x8   :  { %140 = vmatpush3.bf16.msra.mxu0 %v139_v7  ;;  %p152_p3 = por %p151_p2, %p150_p1 }
   0xa   :  { %p153_p4 = pnand %p152_p3, %p146_p0 }
   0xb   :  { %133 = vmatmul.mubr.msk.f32.vlgmr.msra.gmra.mrb[0].mxu0 %vm27_vm1, %v15_v8 }
  0xde   :  { %v97_v10 = vpop.f32.mrb[0].mxu0 }
  0xdf   :  { %v98_v11 = vadd.f32 %v117_v9, %v97_v10  ;;  %v134_v12 = vpop.f32.mrb[1].mxu0 }
  0xe1   :  { %102 = vst.msk [vmem:[#allocation2] sm:$0xff] %vm101_vm2, %v98_v11 }
  0xe2   :  { %156 = shalt.err (!%p153_p4)
}
  0xe3   :  { %s157_s27 = scalar_lea.hbm %s226_s3, 128 }
  0xe4   :  { %p158_p5 = scmp.ne.s32.totalorder %s226_s3, %s157_s27  ;;  %p161_p6 = scmp.lt.u32.totalorder %s157_s27, %s226_s3 }
  0xe6   :  { %p163_p7 = pnand %p161_p6, %p158_p5 }
  0xe8   :  { %166 = shalt.err (!%p163_p7)
}
  0xe9   :  { %112 = dma.vmem_to_hbm [thread:$0]  %s110_s1, 128, %s226_s3, [#allocation3]  }
  0xea   :  { %167 = dma.done.wait [#allocation3], 128  }
  0xeb   :  { %168 = vsyncadd [#allocation3], 4294967168 }
  0xec   :  { %116 = vsyncpa [#allocation3], 1 }

</bundles_post_ra>
